<compile_context>
chip_gen: v5e
topology: v5e:2x2
jax: 0.10.0
libtpu: 0.0.40
codegen_flags: <defaults>
</compile_context>

<pallas_src>
from functools import partial

import numpy as np
import jax
import jax.numpy as jnp
from jax.experimental import pallas as pl
from jax.experimental.pallas import tpu as pltpu

CUBIC_A = -0.75                  # PyTorch's bicubic coefficient
COMPUTE_DTYPE = jnp.bfloat16     # MXU input dtype (accumulation stays f32)


def _cubic_weight(x):
    x = abs(float(x))
    a = CUBIC_A
    if x <= 1.0:
        return (a + 2.0) * x ** 3 - (a + 3.0) * x ** 2 + 1.0
    if x < 2.0:
        return a * x ** 3 - 5.0 * a * x ** 2 + 8.0 * a * x - 4.0 * a
    return 0.0


def bicubic_upsample_matrix(n):
    """(2n, n) matrix M such that M @ v reproduces torch's 2x bicubic
    upsample along one axis (align_corners=False, clamped borders)."""
    M = np.zeros((2 * n, n), dtype=np.float32)
    for j in range(2 * n):
        src = (j + 0.5) / 2.0 - 0.5          # source coord, align_corners=False
        x0 = int(np.floor(src))
        t = src - x0
        taps = (x0 - 1, x0, x0 + 1, x0 + 2)
        ws = (_cubic_weight(1.0 + t), _cubic_weight(t),
              _cubic_weight(1.0 - t), _cubic_weight(2.0 - t))
        for tap, w in zip(taps, ws):
            M[j, min(max(tap, 0), n - 1)] += w   # border clamp (accumulate)
    return M


def _upsample_kernel(x_ref, mh_ref, mwbd_ref, o_ref):
    # x_ref:    (H, L)     packed block of Bb images (L = Bb*W lanes)
    # mh_ref:   (tm, H)    row tile of the height interpolation matrix (bf16)
    # mwbd_ref: (L, 2L)    block-diag of Bb copies of M_w^T (Bb==1 -> plain M_w^T)
    # o_ref:    (tm, 2L)   row tile of the packed upsampled block
    x = x_ref[...].astype(COMPUTE_DTYPE)
    t = jnp.dot(mh_ref[...], x, preferred_element_type=jnp.float32)
    t = t.astype(COMPUTE_DTYPE)
    o_ref[...] = jnp.dot(t, mwbd_ref[...],
                         preferred_element_type=jnp.float32).astype(o_ref.dtype)


def _pick_batch_block(B, W):
    """Smallest number of images per lane block such that the fused lane
    width Bb*W is 128-aligned (lane-dense loads/stores, unmasked vst).
    Once W >= 128 this returns 1, i.e. no block-diagonal FLOP inflation.
    Falls back to the full batch (block == full array dim, still legal)."""
    for bb in range(1, B + 1):
        if B % bb == 0 and (bb * W) % 128 == 0:
            return bb
    return B


def _pick_row_tile(out_rows, nb):
    """Output-row tile size: a multiple of 8 dividing out_rows (or the full
    extent). If the batch axis has a single block, force >= 2 row tiles so
    the 'parallel' grid can still shard across TensorCores."""
    target = 512
    if nb == 1 and out_rows >= 16:
        target = min(target, out_rows // 2)
    if out_rows <= target:
        return out_rows
    best = None
    for t in range(8, target + 1, 8):
        if out_rows % t == 0:
            best = t
    return best if best is not None else out_rows


def _vmem_limit_bytes():
    """Generation-aware VMEM limit: ~3/4 of physical capacity, capped."""
    try:
        cap = int(getattr(pltpu.get_tpu_info(), "vmem_capacity_bytes", 0))
    except Exception:
        cap = 0
    if cap <= 0:
        cap = 64 * 1024 * 1024          # conservative (v7x-sized) fallback
    return min(cap * 3 // 4, 100 * 1024 * 1024)


def _bicubic_upsample_2x_packed(x2d, B, W):
    """One 2x bicubic step on the packed (H, B*W) layout."""
    H = x2d.shape[0]
    assert x2d.shape[1] == B * W

    Bb = _pick_batch_block(B, W)
    nb = B // Bb
    L = Bb * W

    tm = _pick_row_tile(2 * H, nb)
    n_rt = (2 * H) // tm

    mh = jnp.asarray(bicubic_upsample_matrix(H), dtype=COMPUTE_DTYPE)   # (2H, H)
    mwt = bicubic_upsample_matrix(W).T                                  # (W, 2W)
    if Bb == 1:
        mwbd = jnp.asarray(mwt, dtype=COMPUTE_DTYPE)                    # (W, 2W)
    else:
        # tiny block-diagonal only used while W < 128 (early, cheap iterations)
        mwbd = jnp.asarray(np.kron(np.eye(Bb, dtype=np.float32), mwt),
                           dtype=COMPUTE_DTYPE)                         # (L, 2L)

    out_shape = jax.ShapeDtypeStruct((2 * H, 2 * B * W), x2d.dtype)
    return pl.pallas_call(
        _upsample_kernel,
        out_shape=out_shape,
        grid=(nb, n_rt),                       # row axis innermost: x block stays resident
        in_specs=[
            pl.BlockSpec((H, L), lambda i, r: (0, i)),
            pl.BlockSpec((tm, H), lambda i, r: (r, 0)),
            pl.BlockSpec((L, 2 * L), lambda i, r: (0, 0)),
        ],
        out_specs=pl.BlockSpec((tm, 2 * L), lambda i, r: (r, i)),
        compiler_params=pltpu.CompilerParams(
            dimension_semantics=("parallel", "parallel"),
            vmem_limit_bytes=_vmem_limit_bytes()),
    )(x2d, mh, mwbd)


@partial(jax.jit, static_argnums=1)
def upsample(img, n_iter):
    """Pallas equivalent of Upsample(n_iter).forward(img), NCHW layout."""
    N, C, H, W = img.shape
    B = N * C
    # pack once:  (N,C,H,W) -> (H, N*C*W)   (columns ordered (n, c, w))
    x2d = jnp.transpose(img, (2, 0, 1, 3)).reshape(H, B * W)
    h, w = H, W
    for _ in range(n_iter):
        x2d = _bicubic_upsample_2x_packed(x2d, B, w)
        h, w = 2 * h, 2 * w
    # unpack once: (h, N*C*w) -> (N, C, h, w)
    return x2d.reshape(h, N, C, w).transpose(1, 2, 0, 3)


def _reference_upsample(img, n_iter):
    """Pure-jnp (f32) reference using the same PyTorch interpolation matrices."""
    for _ in range(n_iter):
        H, W = img.shape[2], img.shape[3]
        mh = jnp.asarray(bicubic_upsample_matrix(H))
        mw = jnp.asarray(bicubic_upsample_matrix(W))
        img = jnp.einsum('ph,nchw,qw->ncpq', mh, img, mw)
    return img


if __name__ == "__main__":
    key = jax.random.PRNGKey(0)
    # small NCHW input consistent with the module's forward
    x = jax.random.normal(key, (2, 4, 16, 16), dtype=jnp.float32)
    n_iter = 2  # module hyperparameter (no learnable weights in this module)

    out = jax.block_until_ready(upsample(x, n_iter))
    assert out.shape == (2, 4, 16 * 2 ** n_iter, 16 * 2 ** n_iter)
    assert out.dtype == x.dtype

    # sanity check against a plain-XLA f32 implementation of the same math
    # (bf16 MXU inputs with f32 accumulation => well inside this tolerance)
    ref = jax.block_until_ready(_reference_upsample(x, n_iter))
    assert jnp.allclose(out, ref, atol=5e-2, rtol=5e-2), "mismatch vs reference"

    print("KERNEL_OK")
</pallas_src>

<mosaic_0001>
module attributes {stable_mosaic.version = 11 : i64} {
  func.func @_upsample_kernel(%arg0: i32, %arg1: i32, %arg2: memref<32x128xf32, #tpu.memory_space<vmem>>, %arg3: memref<64x32xbf16, #tpu.memory_space<vmem>>, %arg4: memref<128x256xbf16, #tpu.memory_space<vmem>>, %arg5: memref<64x256xf32, #tpu.memory_space<vmem>>) attributes {dimension_semantics = [#tpu.dimension_semantics<parallel>, #tpu.dimension_semantics<parallel>], iteration_bounds = array<i64: 2, 1>, scalar_prefetch = 0 : i64, scratch_operands = 0 : i64, tpu.core_type = #tpu.core_type<tc>, window_params = [{transform_indices = @transform_0, window_bounds = array<i64: 32, 128>}, {transform_indices = @transform_1, window_bounds = array<i64: 64, 32>}, {pipeline_mode = #tpu.pipeline_mode<synchronous>, transform_indices = @transform_2, window_bounds = array<i64: 128, 256>}, {transform_indices = @transform_3, window_bounds = array<i64: 64, 256>}]} {
    %c0 = arith.constant 0 : index
    %c0_0 = arith.constant 0 : index
    %0 = vector.load %arg2[%c0, %c0_0] : memref<32x128xf32, #tpu.memory_space<vmem>>, vector<32x128xf32>
    %1 = arith.truncf %0 : vector<32x128xf32> to vector<32x128xbf16>
    %c0_1 = arith.constant 0 : index
    %c0_2 = arith.constant 0 : index
    %2 = vector.load %arg3[%c0_1, %c0_2] : memref<64x32xbf16, #tpu.memory_space<vmem>>, vector<64x32xbf16>
    %cst = arith.constant dense<0.000000e+00> : vector<64x128xf32>
    %3 = tpu.matmul %2, %1, %cst {dimension_numbers = #tpu.dot_dimension_numbers<[1], [0], [0], [1], [0, 0, 1, 1], [], []>} : vector<64x32xbf16>, vector<32x128xbf16>, vector<64x128xf32> -> vector<64x128xf32>
    %4 = arith.truncf %3 : vector<64x128xf32> to vector<64x128xbf16>
    %c0_3 = arith.constant 0 : index
    %c0_4 = arith.constant 0 : index
    %5 = vector.load %arg4[%c0_3, %c0_4] : memref<128x256xbf16, #tpu.memory_space<vmem>>, vector<128x256xbf16>
    %cst_5 = arith.constant dense<0.000000e+00> : vector<64x256xf32>
    %6 = tpu.matmul %4, %5, %cst_5 {dimension_numbers = #tpu.dot_dimension_numbers<[1], [0], [0], [1], [0, 0, 1, 1], [], []>} : vector<64x128xbf16>, vector<128x256xbf16>, vector<64x256xf32> -> vector<64x256xf32>
    %c0_6 = arith.constant 0 : index
    %c0_7 = arith.constant 0 : index
    %7 = vector.load %arg5[%c0_6, %c0_7] : memref<64x256xf32, #tpu.memory_space<vmem>>, vector<64x256xf32>
    tpu.vector_store %arg5[%c0_6, %c0_7], %6 {strides = array<i32>} : memref<64x256xf32, #tpu.memory_space<vmem>>, vector<64x256xf32>,
    return
  }
  func.func @transform_0(%arg0: i32, %arg1: i32) -> (i32, i32) {
    %c0_i32 = arith.constant 0 : i32
    %c0_i32_0 = arith.constant 0 : i32
    return %c0_i32, %arg0 : i32, i32
  }
  func.func @transform_1(%arg0: i32, %arg1: i32) -> (i32, i32) {
    %c0_i32 = arith.constant 0 : i32
    %c0_i32_0 = arith.constant 0 : i32
    return %arg1, %c0_i32 : i32, i32
  }
  func.func @transform_2(%arg0: i32, %arg1: i32) -> (i32, i32) {
    %c0_i32 = arith.constant 0 : i32
    %c0_i32_0 = arith.constant 0 : i32
    %c0_i32_1 = arith.constant 0 : i32
    return %c0_i32, %c0_i32_0 : i32, i32
  }
  func.func @transform_3(%arg0: i32, %arg1: i32) -> (i32, i32) {
    %c0_i32 = arith.constant 0 : i32
    return %arg1, %arg0 : i32, i32
  }
}

module attributes {stable_mosaic.version = 11 : i64} {
  func.func @_upsample_kernel(%arg0: i32, %arg1: i32, %arg2: memref<16x128xf32, #tpu.memory_space<vmem>>, %arg3: memref<16x16xbf16, #tpu.memory_space<vmem>>, %arg4: memref<128x256xbf16, #tpu.memory_space<vmem>>, %arg5: memref<16x256xf32, #tpu.memory_space<vmem>>) attributes {dimension_semantics = [#tpu.dimension_semantics<parallel>, #tpu.dimension_semantics<parallel>], iteration_bounds = array<i64: 1, 2>, scalar_prefetch = 0 : i64, scratch_operands = 0 : i64, tpu.core_type = #tpu.core_type<tc>, window_params = [{transform_indices = @transform_0, window_bounds = array<i64: 16, 128>}, {transform_indices = @transform_1, window_bounds = array<i64: 16, 16>}, {pipeline_mode = #tpu.pipeline_mode<synchronous>, transform_indices = @transform_2, window_bounds = array<i64: 128, 256>}, {transform_indices = @transform_3, window_bounds = array<i64: 16, 256>}]} {
    %c0 = arith.constant 0 : index
    %c0_0 = arith.constant 0 : index
    %0 = vector.load %arg2[%c0, %c0_0] : memref<16x128xf32, #tpu.memory_space<vmem>>, vector<16x128xf32>
    %1 = arith.truncf %0 : vector<16x128xf32> to vector<16x128xbf16>
    %c0_1 = arith.constant 0 : index
    %c0_2 = arith.constant 0 : index
    %2 = vector.load %arg3[%c0_1, %c0_2] : memref<16x16xbf16, #tpu.memory_space<vmem>>, vector<16x16xbf16>
    %cst = arith.constant dense<0.000000e+00> : vector<16x128xf32>
    %3 = tpu.matmul %2, %1, %cst {dimension_numbers = #tpu.dot_dimension_numbers<[1], [0], [0], [1], [0, 0, 1, 1], [], []>} : vector<16x16xbf16>, vector<16x128xbf16>, vector<16x128xf32> -> vector<16x128xf32>
    %4 = arith.truncf %3 : vector<16x128xf32> to vector<16x128xbf16>
    %c0_3 = arith.constant 0 : index
    %c0_4 = arith.constant 0 : index
    %5 = vector.load %arg4[%c0_3, %c0_4] : memref<128x256xbf16, #tpu.memory_space<vmem>>, vector<128x256xbf16>
    %cst_5 = arith.constant dense<0.000000e+00> : vector<16x256xf32>
    %6 = tpu.matmul %4, %5, %cst_5 {dimension_numbers = #tpu.dot_dimension_numbers<[1], [0], [0], [1], [0, 0, 1, 1], [], []>} : vector<16x128xbf16>, vector<128x256xbf16>, vector<16x256xf32> -> vector<16x256xf32>
    %c0_6 = arith.constant 0 : index
    %c0_7 = arith.constant 0 : index
    %7 = vector.load %arg5[%c0_6, %c0_7] : memref<16x256xf32, #tpu.memory_space<vmem>>, vector<16x256xf32>
    tpu.vector_store %arg5[%c0_6, %c0_7], %6 {strides = array<i32>} : memref<16x256xf32, #tpu.memory_space<vmem>>, vector<16x256xf32>,
    return
  }
  func.func @transform_0(%arg0: i32, %arg1: i32) -> (i32, i32) {
    %c0_i32 = arith.constant 0 : i32
    %c0_i32_0 = arith.constant 0 : i32
    return %c0_i32, %arg0 : i32, i32
  }
  func.func @transform_1(%arg0: i32, %arg1: i32) -> (i32, i32) {
    %c0_i32 = arith.constant 0 : i32
    %c0_i32_0 = arith.constant 0 : i32
    return %arg1, %c0_i32 : i32, i32
  }
  func.func @transform_2(%arg0: i32, %arg1: i32) -> (i32, i32) {
    %c0_i32 = arith.constant 0 : i32
    %c0_i32_0 = arith.constant 0 : i32
    %c0_i32_1 = arith.constant 0 : i32
    return %c0_i32, %c0_i32_0 : i32, i32
  }
  func.func @transform_3(%arg0: i32, %arg1: i32) -> (i32, i32) {
    %c0_i32 = arith.constant 0 : i32
    return %arg1, %arg0 : i32, i32
  }
}

</mosaic_0001>

<bundles_post_ra>
// kernel: upsample.2
= control target key start
LH: loop header
LB: loop body
LE: loop exit
PB: predicated region body
PF: predicated region fallthrough
CT: control target
= control target key end

     0   :  { %s641_s12 = smov 0   ;;  %s643_s13 = smov 0   ;;  %s780_s0 = inlined_call_operand.vmem [shape: f32[16,128], index: 0, kind: input, shape index: {}]   ;;  %s781_s1 = inlined_call_operand.vmem [shape: bf16[32,16], index: 1, kind: input, shape index: {}]   ;;  %s782_s2 = inlined_call_operand.vmem [shape: bf16[128,256], index: 2, kind: input, shape index: {}]   ;;  %s783_s3 = inlined_call_operand.vmem [shape: f32[32,256], index: 3, kind: output, shape index: {}]  }
   0x1   :  { %s645_s14 = smov 0  }
   0x2 LB: > { %s22_s15 = sadd.s32 1, %s615_s13  ;;  %p478_p0 = scmp.ge.s32.totalorder %s619_s14, 1  ;;  %s619_s14 = sphi %s645_s14, %s13_s14   ;;  %s615_s13 = sphi %s643_s13, %s785_s13   ;;  %s611_s12 = sphi %s641_s12, %s784_s12  }
   0x3   : > { %p23_p1 = scmp.ge.s32.totalorder %s22_s15, 2  ;;  %p161_p2 = scmp.lt.s32.totalorder %s619_s14, 3 }
   0x5   : > { %s787_s15 = smov (%p23_p1, %s22_s15), 0  ;;  %p162_p3 = pnand %p478_p0, %p161_p2 }
   0x6   : > { %s479_s20 = sshll.u32 (!%p162_p3), %s611_s12, 1 }
   0x7   : > { %165 = sbr.rel (%p162_p3) target bundleno = 295 (0x127), region = 32  ;;  %p199_p4 = scmp.lt.s32.totalorder (!%p162_p3), %s479_s20, 3 }
   0xc   : > { %v217_v0 = vld [vmem:[%s780_s0] sm:$0xff]  ;;  %v218_v1 = vld [vmem:[%s780_s0 + $0x8] sm:$0xff]  ;;  %v547_v2 = vld [vmem:[%s782_s2 + $0x70] sm:$0xf]  ;;  %s789_s20 = smov (!%p199_p4, %s479_s20), 3  ;;  %vm227_vm0 = vcmask 130048  }
   0xd   : > { %v219_v3 = vpack.c.bf16 %v218_v1, %v217_v0  ;;  %v572_v4 = vld [vmem:[%s782_s2 + $0x74] sm:$0xf0]  ;;  %v571_v5 = vld [vmem:[%s782_s2 + $0x74] sm:$0xf]  ;;  %v549_v7 = vld [vmem:[%s782_s2 + $0x78] sm:$0xf0] }
   0xe   : > { %v548_v6 = vor.u32 %v572_v4, %v547_v2  ;;  %v539_v8 = vld [vmem:[%s782_s2 + $0x60] sm:$0xf]  ;;  %v570_v9 = vld [vmem:[%s782_s2 + $0x64] sm:$0xf0]  ;;  %v552_v10 = vor.u32 %v571_v5, %v549_v7  ;;  %v569_v11 = vld [vmem:[%s782_s2 + $0x64] sm:$0xf] }
   0xf   : > { %238 = vmatpush.bf16.msra.mxu0 %v219_v3  ;;  %v541_v12 = vld [vmem:[%s782_s2 + $0x68] sm:$0xf0]  ;;  %v540_v13 = vor.u32 %v570_v9, %v539_v8  ;;  %s480_s10 = sshll.u32 %s789_s20, 2  ;;  %v531_v15 = vld [vmem:[%s782_s2 + $0x50] sm:$0xf]  ;;  %s555_s19 = sshll.u32 %s789_s20, 4 }
  0x10   : > { %342 = vmatpush.bf16.msra.mxu1 %v548_v6  ;;  %356 = vmatpush.bf16.msra.mxu2 %v552_v10  ;;  %v544_v14 = vor.u32 %v569_v11, %v541_v12  ;;  %v568_v16 = vld [vmem:[%s782_s2 + $0x54] sm:$0xf0]  ;;  %s202_s21 = scalar_lea.vmem %s781_s1, %s480_s10  ;;  %v567_v17 = vld [vmem:[%s782_s2 + $0x54] sm:$0xf]  ;;  %v533_v18 = vld [vmem:[%s782_s2 + $0x58] sm:$0xf0]  ;;  %s213_s23 = scalar_lea.vmem %s783_s3, %s555_s19 }
  0x11   : > { %v556_v19 = vld [vmem:[%s202_s21] sm:$0xff]  ;;  %v532_v20 = vor.u32 %v568_v16, %v531_v15  ;;  %v536_v21 = vor.u32 %v567_v17, %v533_v18  ;;  %v566_v23 = vld [vmem:[%s782_s2 + $0x44] sm:$0xf0]  ;;  %v525_v25 = vld [vmem:[%s782_s2 + $0x48] sm:$0xf0] }
  0x12   : > { %488 = vmatmul.msk.bf16.vlgmr.msra.gmra.mxu0 %vm227_vm0, %v556_v19  ;;  %v523_v22 = vld [vmem:[%s782_s2 + $0x40] sm:$0xf]  ;;  %v565_v24 = vld [vmem:[%s782_s2 + $0x44] sm:$0xf]  ;;  %v515_v28 = vld [vmem:[%s782_s2 + $0x30] sm:$0xf] }
  0x13   : > { %v524_v26 = vor.u32 %v566_v23, %v523_v22  ;;  %v528_v27 = vor.u32 %v565_v24, %v525_v25  ;;  %v564_v29 = vld [vmem:[%s782_s2 + $0x34] sm:$0xf0]  ;;  %v563_v30 = vld [vmem:[%s782_s2 + $0x34] sm:$0xf]  ;;  %v517_v31 = vld [vmem:[%s782_s2 + $0x38] sm:$0xf0] }
  0x14   : > { %343 = vmatpush.bf16.msra.mxu1 %v540_v13  ;;  %357 = vmatpush.bf16.msra.mxu2 %v544_v14  ;;  %v516_v32 = vor.u32 %v564_v29, %v515_v28  ;;  %v520_v33 = vor.u32 %v563_v30, %v517_v31  ;;  %v507_v34 = vld [vmem:[%s782_s2 + $0x20] sm:$0xf]  ;;  %v562_v35 = vld [vmem:[%s782_s2 + $0x24] sm:$0xf0]  ;;  %v561_v36 = vld [vmem:[%s782_s2 + $0x24] sm:$0xf] }
  0x15   : > { %v508_v37 = vor.u32 %v562_v35, %v507_v34  ;;  %v509_v38 = vld [vmem:[%s782_s2 + $0x28] sm:$0xf0]  ;;  %v499_v40 = vld [vmem:[%s782_s2 + $0x10] sm:$0xf]  ;;  %v560_v41 = vld [vmem:[%s782_s2 + $0x14] sm:$0xf0] }
  0x16   : > { %v512_v39 = vor.u32 %v561_v36, %v509_v38  ;;  %v559_v42 = vld [vmem:[%s782_s2 + $0x14] sm:$0xf]  ;;  %v500_v43 = vor.u32 %v560_v41, %v499_v40  ;;  %v501_v44 = vld [vmem:[%s782_s2 + $0x18] sm:$0xf0]  ;;  %v491_v46 = vld [vmem:[%s782_s2] sm:$0xf] }
  0x17   : > { %v504_v45 = vor.u32 %v559_v42, %v501_v44  ;;  %v558_v47 = vld [vmem:[%s782_s2 + $0x4] sm:$0xf0]  ;;  %v557_v48 = vld [vmem:[%s782_s2 + $0x4] sm:$0xf]  ;;  %v493_v50 = vld [vmem:[%s782_s2 + $0x8] sm:$0xf0] }
  0x18   : > { %344 = vmatpush.bf16.msra.mxu1 %v532_v20  ;;  %358 = vmatpush.bf16.msra.mxu2 %v536_v21  ;;  %v492_v49 = vor.u32 %v558_v47, %v491_v46  ;;  %v496_v51 = vor.u32 %v557_v48, %v493_v50 }
  0x1c   : > { %345 = vmatpush.bf16.msra.mxu1 %v524_v26  ;;  %359 = vmatpush.bf16.msra.mxu2 %v528_v27 }
  0x20   : > { %346 = vmatpush.bf16.msra.mxu1 %v516_v32  ;;  %360 = vmatpush.bf16.msra.mxu2 %v520_v33 }
  0x24   : > { %347 = vmatpush.bf16.msra.mxu1 %v508_v37  ;;  %361 = vmatpush.bf16.msra.mxu2 %v512_v39 }
  0x28   : > { %348 = vmatpush.bf16.msra.mxu1 %v500_v43  ;;  %362 = vmatpush.bf16.msra.mxu2 %v504_v45 }
  0x2c   : > { %349 = vmatpush.bf16.msra.mxu1 %v492_v49  ;;  %363 = vmatpush.bf16.msra.mxu2 %v496_v51 }
  0x8f   : > { %v240_v52 = vpop.f32.mrf.mxu0 }
  0x97   : > { %v242_v53 = vpop.f32.mrf.mxu0 }
  0x98   : > { %v245_v54 = vpack.c.bf16 %v242_v53, %v240_v52 }
  0x9a   : > { %350 = vmatmul.bf16.vlgmr.msra.gmra.mxu1 %v245_v54  ;;  %364 = vmatmul.bf16.vlgmr.msra.gmra.mxu2 %v245_v54 }
 0x117   : > { %v351_v55 = vpop.f32.mrf.mxu1 }
 0x118   : > { %370 = vst [vmem:[%s213_s23] sm:$0xff] %v351_v55 }
 0x11d   : > { %v365_v56 = vpop.f32.mrf.mxu2 }
 0x11e   : > { %371 = vst [vmem:[%s213_s23 + $0x8] sm:$0xff] %v365_v56 }
 0x11f   : > { %v353_v57 = vpop.f32.mrf.mxu1 }
 0x120   : > { %372 = vst [vmem:[%s213_s23 + $0x10] sm:$0xff] %v353_v57 }
 0x125   : > { %v367_v58 = vpop.f32.mrf.mxu2 }
 0x126   : > { %373 = vst [vmem:[%s213_s23 + $0x18] sm:$0xff] %v367_v58 }
 0x127 PF: > { %s13_s14 = sadd.s32 1, %s619_s14   ;;  %s784_s12 = smov %s615_s13 }
 0x128   : > { %p10_p5 = scmp.ge.s32.totalorder %s13_s14, 4   ;;  %s785_s13 = smov %s787_s15 }
 0x12a   :  { %12 = sbr.rel (!%p10_p5) target bundleno = 2 (0x2), region = 65 }

// kernel: upsample.3
= control target key start
LH: loop header
LB: loop body
LE: loop exit
PB: predicated region body
PF: predicated region fallthrough
CT: control target
= control target key end

     0   :  { %s880_s12 = smov 0   ;;  %s882_s13 = smov 0   ;;  %s1102_s0 = inlined_call_operand.vmem [shape: f32[32,256], index: 0, kind: input, shape index: {}]   ;;  %s1103_s1 = inlined_call_operand.vmem [shape: bf16[64,32], index: 1, kind: input, shape index: {}]   ;;  %s1104_s2 = inlined_call_operand.vmem [shape: bf16[128,256], index: 2, kind: input, shape index: {}]   ;;  %s1105_s3 = inlined_call_operand.vmem [shape: f32[64,512], index: 3, kind: output, shape index: {}]  }
   0x1   :  { %s884_s14 = smov 0   ;;  %s886_s15 = smov 0  }
   0x2   :  { %s888_s16 = smov 0  }
   0x3 LB: > { %s25_s17 = sadd.s32 1, %s854_s15  ;;  %s644_s18 = sadd.s32 4294967295, %s858_s16   ;;  %s858_s16 = sphi %s888_s16, %s13_s16   ;;  %s854_s15 = sphi %s886_s15, %s1110_s15   ;;  %s850_s14 = sphi %s884_s14, %s1109_s14   ;;  %s846_s13 = sphi %s882_s13, %s1108_s13   ;;  %s842_s12 = sphi %s880_s12, %s1107_s12  }
   0x4   : > { %p27_p0 = scmp.ge.s32.totalorder %s25_s17, 2  ;;  %p39_p1 = scmp.ne.s32.totalorder %s846_s13, %s842_s12 }
   0x5   : > { %p40_p2 = scmp.eq.s32.totalorder %s858_s16, 0  ;;  %p118_p4 = scmp.eq.s32.totalorder %s644_s18, 1 }
   0x6   : > { %s1112_s17 = smov (%p27_p0, %s25_s17), 0  ;;  %s32_s20 = sadd.s32 1, %s846_s13 }
   0x7   : > { %p41_p3 = por %p40_p2, %p39_p1  ;;  %s29_s19 = ssub.s32 %s854_s15, %s1112_s17 }
   0x8   : > { %p30_p5 = scmp.eq.s32.totalorder %s29_s19, 0  ;;  %p915_p6 = por %p118_p4, %p39_p1 }
   0x9   : > { %p648_p7 = scmp.ge.s32.totalorder %s858_s16, 2 }
   0xa   : > { %s920_s22 = scalar_select %p30_p5, %s846_s13, %s32_s20  }
   0xb   : > { %152 = sbr.rel (%p648_p7) target bundleno = 24 (0x18), region = 24 }
  0x10   : > { %155 = sbr.rel (!%p41_p3) target bundleno = 24 (0x18), region = 28  ;;  %s157_s23 = sand.u32 (%p41_p3), 1, %s846_s13  }
  0x11   : > { %s650_s24 = sshll.u32 (%p41_p3), %s854_s15, 3  ;;  %s649_s25 = sshll.u32 (%p41_p3), %s157_s23, 5 }
  0x12   : > { %s161_s28 = scalar_lea.vmem (%p41_p3), %s1102_s0, %s650_s24  ;;  %s159_s29 = scalar_lea.vmem (%p41_p3), [#allocation2], %s649_s25 }
  0x13   : > { %v196_v0 = vld [vmem:[%s161_s28] sm:$0xff] (%p41_p3)  ;;  %v198_v1 = vld [vmem:[%s161_s28 + $0x10] sm:$0xff] (%p41_p3) }
  0x14   : > { %v200_v2 = vld [vmem:[%s161_s28 + $0x20] sm:$0xff] (%p41_p3)  ;;  %197 = vst [vmem:[%s159_s29] sm:$0xff] (%p41_p3), %v196_v0  ;;  %v202_v3 = vld [vmem:[%s161_s28 + $0x30] sm:$0xff] (%p41_p3) }
  0x15   : > { %199 = vst [vmem:[%s159_s29 + $0x8] sm:$0xff] %v198_v1 }
  0x16   : > { %201 = vst [vmem:[%s159_s29 + $0x10] sm:$0xff] %v200_v2 }
  0x17   : > { %203 = vst [vmem:[%s159_s29 + $0x18] sm:$0xff] %v202_v3 }
  0x18 PF: > { %p651_p8 = scmp.ge.s32.totalorder %s858_s16, 1  ;;  %p208_p9 = scmp.lt.s32.totalorder %s858_s16, 3 }
  0x1a   : > { %p209_p10 = pnand %p651_p8, %p208_p9 }
  0x1b   : > { %s215_s30 = sand.u32 (!%p209_p10), 1, %s842_s12  }
  0x1c   : > { %212 = sbr.rel (%p209_p10) target bundleno = 377 (0x179), region = 66  ;;  %s652_s4 = sshll.u32 (!%p209_p10), %s215_s30, 5 }
  0x1d   : > { %s217_s5 = scalar_lea.vmem (!%p209_p10), [#allocation2], %s652_s4  ;;  %s653_s6 = sshll.u32 (!%p209_p10), %s215_s30, 7 }
  0x1e   : > { %s1047_s7 = scalar_lea.vmem (!%p209_p10), [#allocation3], %s653_s6 }
  0x21   : > { %v253_v4 = vld [vmem:[%s217_s5 + $0x10] sm:$0xff]  ;;  %v254_v5 = vld [vmem:[%s217_s5 + $0x18] sm:$0xff]  ;;  %v251_v6 = vld [vmem:[%s217_s5] sm:$0xff]  ;;  %vm285_vm0 = vcmask 261120   ;;  %s763_s12 = sshll.u32 (%p915_p6), %s850_s14, 4 }
  0x22   : > { %v256_v7 = vpack.c.bf16 %v254_v5, %v253_v4  ;;  %v252_v8 = vld [vmem:[%s217_s5 + $0x8] sm:$0xff]  ;;  %v743_v10 = vld [vmem:[%s1103_s1] sm:$0xff]  ;;  %v732_v12 = vld [vmem:[%s1104_s2 + $0x70] sm:$0xf]  ;;  %s513_s9 = scalar_lea.vmem (%p915_p6), %s1105_s3, %s763_s12 }
  0x23   : > { %v255_v9 = vpack.c.bf16 %v252_v8, %v251_v6  ;;  %v744_v11 = vld [vmem:[%s1103_s1 + $0x8] sm:$0xff]  ;;  %v762_v13 = vld [vmem:[%s1104_s2 + $0x74] sm:$0xf0]  ;;  %v724_v14 = vld [vmem:[%s1104_s2 + $0x60] sm:$0xf] }
  0x24   : > { %304 = vmatpush.bf16.msra.mxu0 %v256_v7  ;;  %v733_v15 = vor.u32 %v762_v13, %v732_v12  ;;  %v760_v16 = vld [vmem:[%s1104_s2 + $0x64] sm:$0xf0]  ;;  %v716_v18 = vld [vmem:[%s1104_s2 + $0x50] sm:$0xf]  ;;  %v758_v19 = vld [vmem:[%s1104_s2 + $0x54] sm:$0xf0] }
  0x25   : > { %v725_v17 = vor.u32 %v760_v16, %v724_v14  ;;  %v761_v20 = vld [vmem:[%s1104_s2 + $0x74] sm:$0xf]  ;;  %v734_v21 = vld [vmem:[%s1104_s2 + $0x78] sm:$0xf0]  ;;  %v717_v23 = vor.u32 %v758_v19, %v716_v18  ;;  %v708_v24 = vld [vmem:[%s1104_s2 + $0x40] sm:$0xf] }
  0x26   : > { %427 = vmatpush.bf16.msra.mxu1 %v733_v15  ;;  %764 = vmatpush.bf16.msra.mxu3 %v733_v15  ;;  %v737_v22 = vor.u32 %v761_v20, %v734_v21  ;;  %v756_v25 = vld [vmem:[%s1104_s2 + $0x44] sm:$0xf0]  ;;  %v745_v27 = vld [vmem:[%s1103_s1 + $0x10] sm:$0xff]  ;;  %v754_v29 = vld [vmem:[%s1104_s2 + $0x34] sm:$0xf0] }
  0x27   : > { %v709_v26 = vor.u32 %v756_v25, %v708_v24  ;;  %v700_v28 = vld [vmem:[%s1104_s2 + $0x30] sm:$0xf]  ;;  %v692_v31 = vld [vmem:[%s1104_s2 + $0x20] sm:$0xf]  ;;  %v752_v32 = vld [vmem:[%s1104_s2 + $0x24] sm:$0xf0] }
  0x28   : > { %305 = vmatpush.bf16.msra.mxu0 %v255_v9  ;;  %772 = vmatpush.bf16.msra.mxu2 %v737_v22  ;;  %v701_v30 = vor.u32 %v754_v29, %v700_v28  ;;  %v693_v33 = vor.u32 %v752_v32, %v692_v31  ;;  %v684_v34 = vld [vmem:[%s1104_s2 + $0x10] sm:$0xf]  ;;  %v750_v35 = vld [vmem:[%s1104_s2 + $0x14] sm:$0xf0]  ;;  %v676_v37 = vld [vmem:[%s1104_s2] sm:$0xf] }
  0x29   : > { %v685_v36 = vor.u32 %v750_v35, %v684_v34  ;;  %v748_v38 = vld [vmem:[%s1104_s2 + $0x4] sm:$0xf0]  ;;  %v746_v40 = vld [vmem:[%s1103_s1 + $0x18] sm:$0xff]  ;;  %v759_v41 = vld [vmem:[%s1104_s2 + $0x64] sm:$0xf] }
  0x2a   : > { %428 = vmatpush.bf16.msra.mxu1 %v725_v17  ;;  %765 = vmatpush.bf16.msra.mxu3 %v725_v17  ;;  %v677_v39 = vor.u32 %v748_v38, %v676_v37  ;;  %v726_v42 = vld [vmem:[%s1104_s2 + $0x68] sm:$0xf0]  ;;  %v757_v44 = vld [vmem:[%s1104_s2 + $0x54] sm:$0xf]  ;;  %v718_v45 = vld [vmem:[%s1104_s2 + $0x58] sm:$0xf0] }
  0x2b   : > { %670 = vmatmul.msk.bf16.vlgmr.msra.gmra.mxu0 %vm285_vm0, %v743_v10  ;;  %v729_v43 = vor.u32 %v759_v41, %v726_v42  ;;  %v721_v46 = vor.u32 %v757_v44, %v718_v45  ;;  %v755_v47 = vld [vmem:[%s1104_s2 + $0x44] sm:$0xf]  ;;  %v710_v48 = vld [vmem:[%s1104_s2 + $0x48] sm:$0xf0]  ;;  %v753_v50 = vld [vmem:[%s1104_s2 + $0x34] sm:$0xf] }
  0x2c   : > { %v713_v49 = vor.u32 %v755_v47, %v710_v48  ;;  %v702_v51 = vld [vmem:[%s1104_s2 + $0x38] sm:$0xf0]  ;;  %v751_v53 = vld [vmem:[%s1104_s2 + $0x24] sm:$0xf]  ;;  %v694_v54 = vld [vmem:[%s1104_s2 + $0x28] sm:$0xf0] }
  0x2d   : > { %773 = vmatpush.bf16.msra.mxu2 %v729_v43  ;;  %v705_v52 = vor.u32 %v753_v50, %v702_v51  ;;  %v697_v55 = vor.u32 %v751_v53, %v694_v54  ;;  %v749_v56 = vld [vmem:[%s1104_s2 + $0x14] sm:$0xf]  ;;  %v686_v57 = vld [vmem:[%s1104_s2 + $0x18] sm:$0xf0]  ;;  %v747_v59 = vld [vmem:[%s1104_s2 + $0x4] sm:$0xf] }
  0x2e   : > { %429 = vmatpush.bf16.msra.mxu1 %v717_v23  ;;  %766 = vmatpush.bf16.msra.mxu3 %v717_v23  ;;  %v689_v58 = vor.u32 %v749_v56, %v686_v57  ;;  %v678_v60 = vld [vmem:[%s1104_s2 + $0x8] sm:$0xf0] }
  0x2f   : > { %v681_v61 = vor.u32 %v747_v59, %v678_v60 }
  0x31   : > { %774 = vmatpush.bf16.msra.mxu2 %v721_v46 }
  0x32   : > { %430 = vmatpush.bf16.msra.mxu1 %v709_v26  ;;  %767 = vmatpush.bf16.msra.mxu3 %v709_v26 }
  0x35   : > { %775 = vmatpush.bf16.msra.mxu2 %v713_v49 }
  0x36   : > { %431 = vmatpush.bf16.msra.mxu1 %v701_v30  ;;  %768 = vmatpush.bf16.msra.mxu3 %v701_v30 }
  0x39   : > { %776 = vmatpush.bf16.msra.mxu2 %v705_v52 }
  0x3a   : > { %432 = vmatpush.bf16.msra.mxu1 %v693_v33  ;;  %769 = vmatpush.bf16.msra.mxu3 %v693_v33 }
  0x3b   : > { %671 = vmatmul.msk.bf16.gmra.mxu0 %vm285_vm0, %v744_v11 }
  0x3d   : > { %777 = vmatpush.bf16.msra.mxu2 %v697_v55 }
  0x3e   : > { %433 = vmatpush.bf16.msra.mxu1 %v685_v36  ;;  %770 = vmatpush.bf16.msra.mxu3 %v685_v36 }
  0x41   : > { %778 = vmatpush.bf16.msra.mxu2 %v689_v58 }
  0x42   : > { %434 = vmatpush.bf16.msra.mxu1 %v677_v39  ;;  %771 = vmatpush.bf16.msra.mxu3 %v677_v39 }
  0x45   : > { %779 = vmatpush.bf16.msra.mxu2 %v681_v61 }
  0x46   : > { %456 = vmatpush.bf16.msrb.mxu1 %v737_v22 }
  0x4a   : > { %457 = vmatpush.bf16.msrb.mxu1 %v729_v43 }
  0x4b   : > { %672 = vmatmul.msk.bf16.gmra.mxu0 %vm285_vm0, %v745_v27 }
  0x4e   : > { %458 = vmatpush.bf16.msrb.mxu1 %v721_v46 }
  0x52   : > { %459 = vmatpush.bf16.msrb.mxu1 %v713_v49 }
  0x56   : > { %460 = vmatpush.bf16.msrb.mxu1 %v705_v52 }
  0x5a   : > { %461 = vmatpush.bf16.msrb.mxu1 %v697_v55 }
  0x5b   : > { %673 = vmatmul.msk.bf16.gmra.mxu0 %vm285_vm0, %v746_v40 }
  0x5e   : > { %462 = vmatpush.bf16.msrb.mxu1 %v689_v58 }
  0x62   : > { %463 = vmatpush.bf16.msrb.mxu1 %v681_v61 }
  0xa8   : > { %v307_v62 = vpop.f32.mrf.mxu0 }
  0xb0   : > { %v309_v63 = vpop.f32.mrf.mxu0 }
  0xb1   : > { %v327_v0 = vpack.c.bf16 %v309_v63, %v307_v62 }
  0xb3   : > { %435 = vmatmul.bf16.vlgmr.msra.gmra.mxu1 %v327_v0 }
  0xb8   : > { %v312_v1 = vpop.f32.mrf.mxu0 }
  0xc0   : > { %v314_v2 = vpop.f32.mrf.mxu0 }
  0xc1   : > { %v328_v3 = vpack.c.bf16 %v314_v2, %v312_v1 }
  0xc3   : > { %440 = vmatmul.bf16.vlgmr.msra.gmra.mxu3 %v328_v3  ;;  %464 = vmatmul.bf16.vlgmr.msrb.gmra.mxu1 %v327_v0 }
  0xc4   : > { %469 = vmatmul.bf16.vlgmr.msra.gmra.mxu2 %v328_v3 }
  0xc8   : > { %v317_v4 = vpop.f32.mrf.mxu0 }
  0xd0   : > { %v319_v5 = vpop.f32.mrf.mxu0 }
  0xd1   : > { %v329_v6 = vpack.c.bf16 %v319_v5, %v317_v4 }
  0xd3   : > { %445 = vmatmul.bf16.gmra.mxu3 %v329_v6 }
  0xd4   : > { %474 = vmatmul.bf16.gmra.mxu2 %v329_v6 }
  0xd8   : > { %v322_v7 = vpop.f32.mrf.mxu0 }
  0xe0   : > { %v324_v8 = vpop.f32.mrf.mxu0 }
  0xe1   : > { %v330_v9 = vpack.c.bf16 %v324_v8, %v322_v7 }
  0xe3   : > { %450 = vmatmul.bf16.gmra.mxu3 %v330_v9 }
  0xe4   : > { %479 = vmatmul.bf16.gmra.mxu2 %v330_v9 }
 0x130   : > { %v436_v10 = vpop.f32.mrf.mxu1 }
 0x131   : > { %485 = vst [vmem:[%s1047_s7] sm:$0xff] %v436_v10 }
 0x138   : > { %v438_v11 = vpop.f32.mrf.mxu1  ;;  %v526_v26 = vld [vmem:[%s1047_s7] sm:$0xff] (%p915_p6) }
 0x139   : > { %487 = vst [vmem:[%s1047_s7 + $0x10] sm:$0xff] %v438_v11 }
 0x13a   : > { %527 = vst [vmem:[%s513_s9] sm:$0xff] (%p915_p6), %v526_v26 }
 0x140   : > { %v465_v12 = vpop.f32.mrf.mxu1  ;;  %v530_v28 = vld [vmem:[%s1047_s7 + $0x10] sm:$0xff] (%p915_p6) }
 0x141   : > { %486 = vst [vmem:[%s1047_s7 + $0x8] sm:$0xff] %v465_v12 }
 0x142   : > { %531 = vst [vmem:[%s513_s9 + $0x20] sm:$0xff] (%p915_p6), %v530_v28 }
 0x146   : > { %v441_v13 = vpop.f32.mrf.mxu3 }
 0x147   : > { %489 = vst [vmem:[%s1047_s7 + $0x20] sm:$0xff] %v441_v13  ;;  %v470_v14 = vpop.f32.mrf.mxu2 }
 0x148   : > { %490 = vst [vmem:[%s1047_s7 + $0x28] sm:$0xff] %v470_v14  ;;  %v467_v15 = vpop.f32.mrf.mxu1  ;;  %v528_v27 = vld [vmem:[%s1047_s7 + $0x8] sm:$0xff] (%p915_p6) }
 0x149   : > { %488 = vst [vmem:[%s1047_s7 + $0x18] sm:$0xff] %v467_v15 }
 0x14a   : > { %529 = vst [vmem:[%s513_s9 + $0x8] sm:$0xff] (%p915_p6), %v528_v27 }
 0x14e   : > { %v443_v16 = vpop.f32.mrf.mxu3  ;;  %v534_v30 = vld [vmem:[%s1047_s7 + $0x20] sm:$0xff] (%p915_p6) }
 0x14f   : > { %491 = vst [vmem:[%s1047_s7 + $0x30] sm:$0xff] %v443_v16  ;;  %v472_v17 = vpop.f32.mrf.mxu2  ;;  %v536_v31 = vld [vmem:[%s1047_s7 + $0x28] sm:$0xff] (%p915_p6) }
 0x150   : > { %492 = vst [vmem:[%s1047_s7 + $0x38] sm:$0xff] %v472_v17  ;;  %v532_v29 = vld [vmem:[%s1047_s7 + $0x18] sm:$0xff] (%p915_p6) }
 0x151   : > { %533 = vst [vmem:[%s513_s9 + $0x28] sm:$0xff] (%p915_p6), %v532_v29 }
 0x152   : > { %535 = vst [vmem:[%s513_s9 + $0x40] sm:$0xff] (%p915_p6), %v534_v30 }
 0x153   : > { %537 = vst [vmem:[%s513_s9 + $0x48] sm:$0xff] (%p915_p6), %v536_v31 }
 0x156   : > { %v446_v18 = vpop.f32.mrf.mxu3  ;;  %v538_v32 = vld [vmem:[%s1047_s7 + $0x30] sm:$0xff] (%p915_p6) }
 0x157   : > { %493 = vst [vmem:[%s1047_s7 + $0x40] sm:$0xff] %v446_v18  ;;  %v475_v19 = vpop.f32.mrf.mxu2  ;;  %v540_v33 = vld [vmem:[%s1047_s7 + $0x38] sm:$0xff] (%p915_p6) }
 0x158   : > { %494 = vst [vmem:[%s1047_s7 + $0x48] sm:$0xff] %v475_v19 }
 0x159   : > { %539 = vst [vmem:[%s513_s9 + $0x60] sm:$0xff] (%p915_p6), %v538_v32 }
 0x15a   : > { %541 = vst [vmem:[%s513_s9 + $0x68] sm:$0xff] (%p915_p6), %v540_v33 }
 0x15e   : > { %v448_v20 = vpop.f32.mrf.mxu3  ;;  %v542_v34 = vld [vmem:[%s1047_s7 + $0x40] sm:$0xff] (%p915_p6) }
 0x15f   : > { %495 = vst [vmem:[%s1047_s7 + $0x50] sm:$0xff] %v448_v20  ;;  %v477_v21 = vpop.f32.mrf.mxu2  ;;  %v544_v35 = vld [vmem:[%s1047_s7 + $0x48] sm:$0xff] (%p915_p6) }
 0x160   : > { %496 = vst [vmem:[%s1047_s7 + $0x58] sm:$0xff] %v477_v21 }
 0x161   : > { %543 = vst [vmem:[%s513_s9 + $0x80] sm:$0xff] (%p915_p6), %v542_v34 }
 0x162   : > { %545 = vst [vmem:[%s513_s9 + $0x88] sm:$0xff] (%p915_p6), %v544_v35 }
 0x166   : > { %v451_v22 = vpop.f32.mrf.mxu3  ;;  %v546_v36 = vld [vmem:[%s1047_s7 + $0x50] sm:$0xff] (%p915_p6) }
 0x167   : > { %497 = vst [vmem:[%s1047_s7 + $0x60] sm:$0xff] %v451_v22  ;;  %v480_v23 = vpop.f32.mrf.mxu2  ;;  %v548_v37 = vld [vmem:[%s1047_s7 + $0x58] sm:$0xff] (%p915_p6) }
 0x168   : > { %498 = vst [vmem:[%s1047_s7 + $0x68] sm:$0xff] %v480_v23 }
 0x169   : > { %547 = vst [vmem:[%s513_s9 + $0xa0] sm:$0xff] (%p915_p6), %v546_v36 }
 0x16a   : > { %549 = vst [vmem:[%s513_s9 + $0xa8] sm:$0xff] (%p915_p6), %v548_v37 }
 0x16c   : > { %507 = sbr.rel (!%p915_p6) target bundleno = 377 (0x179), region = 74 }
 0x16e   : > { %v453_v24 = vpop.f32.mrf.mxu3  ;;  %v550_v38 = vld [vmem:[%s1047_s7 + $0x60] sm:$0xff] (%p915_p6) }
 0x16f   : > { %499 = vst [vmem:[%s1047_s7 + $0x70] sm:$0xff] %v453_v24  ;;  %v482_v25 = vpop.f32.mrf.mxu2  ;;  %v552_v39 = vld [vmem:[%s1047_s7 + $0x68] sm:$0xff] (%p915_p6) }
 0x170   : > { %500 = vst [vmem:[%s1047_s7 + $0x78] sm:$0xff] %v482_v25 }
 0x171   : > { %551 = vst [vmem:[%s513_s9 + $0xc0] sm:$0xff] %v550_v38 }
 0x172   : > { %553 = vst [vmem:[%s513_s9 + $0xc8] sm:$0xff] %v552_v39 }
 0x176   : > { %v554_v40 = vld [vmem:[%s1047_s7 + $0x70] sm:$0xff] }
 0x177   : > { %v556_v41 = vld [vmem:[%s1047_s7 + $0x78] sm:$0xff]  ;;  %555 = vst [vmem:[%s513_s9 + $0xe0] sm:$0xff] %v554_v40 }
 0x178   : > { %557 = vst [vmem:[%s513_s9 + $0xe8] sm:$0xff] %v556_v41 }
 0x179 PF: > { %s13_s16 = sadd.s32 1, %s858_s16   ;;  %s1107_s12 = smov %s846_s13 }
 0x17a   : > { %p10_p11 = scmp.ge.s32.totalorder %s13_s16, 4   ;;  %s1108_s13 = smov %s920_s22 }
 0x17b   : > { %s1109_s14 = smov %s854_s15  ;;  %s1110_s15 = smov %s1112_s17 }
 0x17c   :  { %12 = sbr.rel (!%p10_p11) target bundleno = 3 (0x3), region = 131 }

</bundles_post_ra>
